<compile_context>
chip_gen: v5e
topology: v5e:2x2
jax: 0.10.0
libtpu: 0.0.40
codegen_flags: <defaults>
</compile_context>

<pallas_src>
import functools

import jax
import jax.numpy as jnp
from jax.experimental import pallas as pl
from jax.experimental.pallas import tpu as pltpu

_LANE = 128
_SUBLANE = 8


def _round_up(x, m):
    return (x + m - 1) // m * m


def _gather_param_kernel(idx_ref, src_hbm, o_ref, buf, sems, *, group):
    """One grid step: DMA-gather `group` rows of the flattened image table
    (row index read from scalar-prefetched SMEM), then apply
    param_fn = clip(x, -0.5, 0.5) + 0.5 on the lane-dense (group, Dp) tile."""
    base = pl.program_id(0) * group

    # Issue all row-gather DMAs for this group back-to-back (DMA engine
    # pipelines them; each is one contiguous row of Dp elements).
    for r in range(group):
        row = idx_ref[base + r]
        pltpu.make_async_copy(
            src_hbm.at[pl.ds(row, 1), :],
            buf.at[pl.ds(r, 1), :],
            sems.at[r],
        ).start()

    # Wait for all of them (src slice here is only a shape/byte-count hint).
    for r in range(group):
        pltpu.make_async_copy(
            src_hbm.at[pl.ds(0, 1), :],
            buf.at[pl.ds(r, 1), :],
            sems.at[r],
        ).wait()

    x = buf[...]
    o_ref[...] = jnp.clip(x, -0.5, 0.5) + 0.5


def input_image_layer_forward(input_tensor, classes, indices, augment=True):
    """Pallas equivalent of InputImageLayer.forward.

    input_tensor: (n_classes, C, H, W) float32 parameter
    classes:      (n_classes,) int32 class labels
    indices:      (B,) int32 gather indices
    Returns (imgs, gathered_classes) with imgs of shape (B, C, H, W).
    """
    n_classes, C, H, W = input_tensor.shape
    D = C * H * W
    B = int(indices.shape[0])
    dtype = input_tensor.dtype
    itemsize = jnp.dtype(dtype).itemsize

    # Lane-dense flattening: last axis padded to a multiple of 128 lanes.
    Dp = _round_up(D, _LANE)
    flat = input_tensor.reshape(n_classes, D)
    if Dp != D:
        flat = jnp.pad(flat, ((0, 0), (0, Dp - D)))

    # Rows per grid step: amortize the ~600-cycle per-step overhead while the
    # working set (gather scratch + double-buffered output block) stays well
    # under the scoped-VMEM limit on every generation (v7x has only 64 MiB).
    row_bytes = Dp * itemsize
    budget = 8 * 1024 * 1024
    group = budget // (3 * row_bytes)
    group = max(_SUBLANE, min(64, (group // _SUBLANE) * _SUBLANE))
    group = min(group, _round_up(B, _SUBLANE))  # don't over-pad tiny batches

    Bp = _round_up(B, group)
    num_steps = Bp // group

    idx = indices.astype(jnp.int32)
    idx_padded = jnp.pad(idx, (0, Bp - B))  # padded rows gather class 0, discarded later

    grid_spec = pltpu.PrefetchScalarGridSpec(
        num_scalar_prefetch=1,
        grid=(num_steps,),
        in_specs=[pl.BlockSpec(memory_space=pl.ANY)],  # raw HBM table, manual DMA gather
        out_specs=pl.BlockSpec((group, Dp), lambda i, idx_ref: (i, 0)),
        scratch_shapes=[
            pltpu.VMEM((group, Dp), dtype),
            pltpu.SemaphoreType.DMA((group,)),
        ],
    )

    out = pl.pallas_call(
        functools.partial(_gather_param_kernel, group=group),
        out_shape=jax.ShapeDtypeStruct((Bp, Dp), dtype),
        grid_spec=grid_spec,
        compiler_params=pltpu.CompilerParams(
            dimension_semantics=("parallel",),  # independent steps -> both TCs on v7x
            vmem_limit_bytes=32 * 1024 * 1024,
        ),
    )(idx_padded, flat)

    imgs = out[:B, :D].reshape(B, C, H, W)

    # TODO(synk): aug_fn is Identity by default; arbitrary kornia augmentation
    # pipelines have no generic Pallas equivalent.
    gathered_classes = jnp.take(classes, idx, axis=0)
    return imgs, gathered_classes


if __name__ == "__main__":
    key = jax.random.PRNGKey(0)

    # Module __init__ equivalents (deterministic, in-script):
    img_shape = (4, 16, 16)  # (C, H, W)
    class_labels = jnp.array([10, 11, 12, 13], dtype=jnp.int32)
    n_classes = class_labels.shape[0]

    input_tensor = (
        jax.random.normal(key, (n_classes, *img_shape), dtype=jnp.float32) * 0.001
    )

    # forward(indices)
    indices = jnp.array([2, 0], dtype=jnp.int32)  # batch = 2

    imgs, cls = input_image_layer_forward(input_tensor, class_labels, indices)
    imgs = jax.block_until_ready(imgs)
    cls = jax.block_until_ready(cls)

    # quick correctness check against plain-JAX reference
    ref_imgs = jnp.clip(input_tensor[indices], -0.5, 0.5) + 0.5
    ref_cls = class_labels[indices]
    assert imgs.shape == (2, *img_shape)
    assert jnp.allclose(imgs, ref_imgs, atol=1e-6)
    assert jnp.array_equal(cls, ref_cls)

    print("KERNEL_OK")
</pallas_src>

<mosaic_0001>
module attributes {stable_mosaic.version = 11 : i64} {
  func.func @_gather_param_kernel(%arg0: i32, %arg1: memref<8xi32, #tpu.memory_space<smem>>, %arg2: memref<4x1024xf32, #tpu.memory_space<any>>, %arg3: memref<8x1024xf32, #tpu.memory_space<vmem>>, %arg4: memref<8x1024xf32, #tpu.memory_space<vmem>>, %arg5: memref<8x!tpu.dma_semaphore, #tpu.memory_space<semaphore_mem>>) attributes {dimension_semantics = [#tpu.dimension_semantics<parallel>], iteration_bounds = array<i64: 1>, scalar_prefetch = 1 : i64, scratch_operands = 2 : i64, tpu.core_type = #tpu.core_type<tc>, window_params = [{}, {transform_indices = @transform_1, window_bounds = array<i64: 8, 1024>}]} {
    %c8_i32 = arith.constant 8 : i32
    %0 = arith.muli %arg0, %c8_i32 : i32
    %c0_i32 = arith.constant 0 : i32
    %1 = arith.addi %0, %c0_i32 : i32
    %2 = arith.index_cast %1 : i32 to index
    %3 = memref.load %arg1[%2] : memref<8xi32, #tpu.memory_space<smem>>
    %c0_i32_0 = arith.constant 0 : i32
    %c0_i32_1 = arith.constant 0 : i32
    %4 = tpu.memref_slice %arg2[%3, %c0_i32_1] : memref<4x1024xf32, #tpu.memory_space<any>> -> memref<1x1024xf32, #tpu.memory_space<any>>
    %c0_i32_2 = arith.constant 0 : i32
    %c0_i32_3 = arith.constant 0 : i32
    %5 = tpu.memref_slice %arg4[%c0_i32_2, %c0_i32_3] : memref<8x1024xf32, #tpu.memory_space<vmem>> -> memref<1x1024xf32, #tpu.memory_space<vmem>>
    %6 = tpu.memref_slice %arg5[%c0_i32_0] : memref<8x!tpu.dma_semaphore, #tpu.memory_space<semaphore_mem>> -> memref<1x!tpu.dma_semaphore, #tpu.memory_space<semaphore_mem>>
    %7 = tpu.memref_squeeze %6 : memref<1x!tpu.dma_semaphore, #tpu.memory_space<semaphore_mem>> -> memref<!tpu.dma_semaphore, #tpu.memory_space<semaphore_mem>>
    tpu.enqueue_dma source(%4 : memref<1x1024xf32, #tpu.memory_space<any>>) target(%5 : memref<1x1024xf32, #tpu.memory_space<vmem>>) target_semaphore(%7 : memref<!tpu.dma_semaphore, #tpu.memory_space<semaphore_mem>>)
    %c1_i32 = arith.constant 1 : i32
    %8 = arith.addi %0, %c1_i32 : i32
    %9 = arith.index_cast %8 : i32 to index
    %10 = memref.load %arg1[%9] : memref<8xi32, #tpu.memory_space<smem>>
    %c1_i32_4 = arith.constant 1 : i32
    %c0_i32_5 = arith.constant 0 : i32
    %11 = tpu.memref_slice %arg2[%10, %c0_i32_5] : memref<4x1024xf32, #tpu.memory_space<any>> -> memref<1x1024xf32, #tpu.memory_space<any>>
    %c1_i32_6 = arith.constant 1 : i32
    %c0_i32_7 = arith.constant 0 : i32
    %12 = tpu.memref_slice %arg4[%c1_i32_6, %c0_i32_7] : memref<8x1024xf32, #tpu.memory_space<vmem>> -> memref<1x1024xf32, #tpu.memory_space<vmem>>
    %13 = tpu.memref_slice %arg5[%c1_i32_4] : memref<8x!tpu.dma_semaphore, #tpu.memory_space<semaphore_mem>> -> memref<1x!tpu.dma_semaphore, #tpu.memory_space<semaphore_mem>>
    %14 = tpu.memref_squeeze %13 : memref<1x!tpu.dma_semaphore, #tpu.memory_space<semaphore_mem>> -> memref<!tpu.dma_semaphore, #tpu.memory_space<semaphore_mem>>
    tpu.enqueue_dma source(%11 : memref<1x1024xf32, #tpu.memory_space<any>>) target(%12 : memref<1x1024xf32, #tpu.memory_space<vmem>>) target_semaphore(%14 : memref<!tpu.dma_semaphore, #tpu.memory_space<semaphore_mem>>)
    %c2_i32 = arith.constant 2 : i32
    %15 = arith.addi %0, %c2_i32 : i32
    %16 = arith.index_cast %15 : i32 to index
    %17 = memref.load %arg1[%16] : memref<8xi32, #tpu.memory_space<smem>>
    %c2_i32_8 = arith.constant 2 : i32
    %c0_i32_9 = arith.constant 0 : i32
    %18 = tpu.memref_slice %arg2[%17, %c0_i32_9] : memref<4x1024xf32, #tpu.memory_space<any>> -> memref<1x1024xf32, #tpu.memory_space<any>>
    %c2_i32_10 = arith.constant 2 : i32
    %c0_i32_11 = arith.constant 0 : i32
    %19 = tpu.memref_slice %arg4[%c2_i32_10, %c0_i32_11] : memref<8x1024xf32, #tpu.memory_space<vmem>> -> memref<1x1024xf32, #tpu.memory_space<vmem>>
    %20 = tpu.memref_slice %arg5[%c2_i32_8] : memref<8x!tpu.dma_semaphore, #tpu.memory_space<semaphore_mem>> -> memref<1x!tpu.dma_semaphore, #tpu.memory_space<semaphore_mem>>
    %21 = tpu.memref_squeeze %20 : memref<1x!tpu.dma_semaphore, #tpu.memory_space<semaphore_mem>> -> memref<!tpu.dma_semaphore, #tpu.memory_space<semaphore_mem>>
    tpu.enqueue_dma source(%18 : memref<1x1024xf32, #tpu.memory_space<any>>) target(%19 : memref<1x1024xf32, #tpu.memory_space<vmem>>) target_semaphore(%21 : memref<!tpu.dma_semaphore, #tpu.memory_space<semaphore_mem>>)
    %c3_i32 = arith.constant 3 : i32
    %22 = arith.addi %0, %c3_i32 : i32
    %23 = arith.index_cast %22 : i32 to index
    %24 = memref.load %arg1[%23] : memref<8xi32, #tpu.memory_space<smem>>
    %c3_i32_12 = arith.constant 3 : i32
    %c0_i32_13 = arith.constant 0 : i32
    %25 = tpu.memref_slice %arg2[%24, %c0_i32_13] : memref<4x1024xf32, #tpu.memory_space<any>> -> memref<1x1024xf32, #tpu.memory_space<any>>
    %c3_i32_14 = arith.constant 3 : i32
    %c0_i32_15 = arith.constant 0 : i32
    %26 = tpu.memref_slice %arg4[%c3_i32_14, %c0_i32_15] : memref<8x1024xf32, #tpu.memory_space<vmem>> -> memref<1x1024xf32, #tpu.memory_space<vmem>>
    %27 = tpu.memref_slice %arg5[%c3_i32_12] : memref<8x!tpu.dma_semaphore, #tpu.memory_space<semaphore_mem>> -> memref<1x!tpu.dma_semaphore, #tpu.memory_space<semaphore_mem>>
    %28 = tpu.memref_squeeze %27 : memref<1x!tpu.dma_semaphore, #tpu.memory_space<semaphore_mem>> -> memref<!tpu.dma_semaphore, #tpu.memory_space<semaphore_mem>>
    tpu.enqueue_dma source(%25 : memref<1x1024xf32, #tpu.memory_space<any>>) target(%26 : memref<1x1024xf32, #tpu.memory_space<vmem>>) target_semaphore(%28 : memref<!tpu.dma_semaphore, #tpu.memory_space<semaphore_mem>>)
    %c4_i32 = arith.constant 4 : i32
    %29 = arith.addi %0, %c4_i32 : i32
    %30 = arith.index_cast %29 : i32 to index
    %31 = memref.load %arg1[%30] : memref<8xi32, #tpu.memory_space<smem>>
    %c4_i32_16 = arith.constant 4 : i32
    %c0_i32_17 = arith.constant 0 : i32
    %32 = tpu.memref_slice %arg2[%31, %c0_i32_17] : memref<4x1024xf32, #tpu.memory_space<any>> -> memref<1x1024xf32, #tpu.memory_space<any>>
    %c4_i32_18 = arith.constant 4 : i32
    %c0_i32_19 = arith.constant 0 : i32
    %33 = tpu.memref_slice %arg4[%c4_i32_18, %c0_i32_19] : memref<8x1024xf32, #tpu.memory_space<vmem>> -> memref<1x1024xf32, #tpu.memory_space<vmem>>
    %34 = tpu.memref_slice %arg5[%c4_i32_16] : memref<8x!tpu.dma_semaphore, #tpu.memory_space<semaphore_mem>> -> memref<1x!tpu.dma_semaphore, #tpu.memory_space<semaphore_mem>>
    %35 = tpu.memref_squeeze %34 : memref<1x!tpu.dma_semaphore, #tpu.memory_space<semaphore_mem>> -> memref<!tpu.dma_semaphore, #tpu.memory_space<semaphore_mem>>
    tpu.enqueue_dma source(%32 : memref<1x1024xf32, #tpu.memory_space<any>>) target(%33 : memref<1x1024xf32, #tpu.memory_space<vmem>>) target_semaphore(%35 : memref<!tpu.dma_semaphore, #tpu.memory_space<semaphore_mem>>)
    %c5_i32 = arith.constant 5 : i32
    %36 = arith.addi %0, %c5_i32 : i32
    %37 = arith.index_cast %36 : i32 to index
    %38 = memref.load %arg1[%37] : memref<8xi32, #tpu.memory_space<smem>>
    %c5_i32_20 = arith.constant 5 : i32
    %c0_i32_21 = arith.constant 0 : i32
    %39 = tpu.memref_slice %arg2[%38, %c0_i32_21] : memref<4x1024xf32, #tpu.memory_space<any>> -> memref<1x1024xf32, #tpu.memory_space<any>>
    %c5_i32_22 = arith.constant 5 : i32
    %c0_i32_23 = arith.constant 0 : i32
    %40 = tpu.memref_slice %arg4[%c5_i32_22, %c0_i32_23] : memref<8x1024xf32, #tpu.memory_space<vmem>> -> memref<1x1024xf32, #tpu.memory_space<vmem>>
    %41 = tpu.memref_slice %arg5[%c5_i32_20] : memref<8x!tpu.dma_semaphore, #tpu.memory_space<semaphore_mem>> -> memref<1x!tpu.dma_semaphore, #tpu.memory_space<semaphore_mem>>
    %42 = tpu.memref_squeeze %41 : memref<1x!tpu.dma_semaphore, #tpu.memory_space<semaphore_mem>> -> memref<!tpu.dma_semaphore, #tpu.memory_space<semaphore_mem>>
    tpu.enqueue_dma source(%39 : memref<1x1024xf32, #tpu.memory_space<any>>) target(%40 : memref<1x1024xf32, #tpu.memory_space<vmem>>) target_semaphore(%42 : memref<!tpu.dma_semaphore, #tpu.memory_space<semaphore_mem>>)
    %c6_i32 = arith.constant 6 : i32
    %43 = arith.addi %0, %c6_i32 : i32
    %44 = arith.index_cast %43 : i32 to index
    %45 = memref.load %arg1[%44] : memref<8xi32, #tpu.memory_space<smem>>
    %c6_i32_24 = arith.constant 6 : i32
    %c0_i32_25 = arith.constant 0 : i32
    %46 = tpu.memref_slice %arg2[%45, %c0_i32_25] : memref<4x1024xf32, #tpu.memory_space<any>> -> memref<1x1024xf32, #tpu.memory_space<any>>
    %c6_i32_26 = arith.constant 6 : i32
    %c0_i32_27 = arith.constant 0 : i32
    %47 = tpu.memref_slice %arg4[%c6_i32_26, %c0_i32_27] : memref<8x1024xf32, #tpu.memory_space<vmem>> -> memref<1x1024xf32, #tpu.memory_space<vmem>>
    %48 = tpu.memref_slice %arg5[%c6_i32_24] : memref<8x!tpu.dma_semaphore, #tpu.memory_space<semaphore_mem>> -> memref<1x!tpu.dma_semaphore, #tpu.memory_space<semaphore_mem>>
    %49 = tpu.memref_squeeze %48 : memref<1x!tpu.dma_semaphore, #tpu.memory_space<semaphore_mem>> -> memref<!tpu.dma_semaphore, #tpu.memory_space<semaphore_mem>>
    tpu.enqueue_dma source(%46 : memref<1x1024xf32, #tpu.memory_space<any>>) target(%47 : memref<1x1024xf32, #tpu.memory_space<vmem>>) target_semaphore(%49 : memref<!tpu.dma_semaphore, #tpu.memory_space<semaphore_mem>>)
    %c7_i32 = arith.constant 7 : i32
    %50 = arith.addi %0, %c7_i32 : i32
    %51 = arith.index_cast %50 : i32 to index
    %52 = memref.load %arg1[%51] : memref<8xi32, #tpu.memory_space<smem>>
    %c7_i32_28 = arith.constant 7 : i32
    %c0_i32_29 = arith.constant 0 : i32
    %53 = tpu.memref_slice %arg2[%52, %c0_i32_29] : memref<4x1024xf32, #tpu.memory_space<any>> -> memref<1x1024xf32, #tpu.memory_space<any>>
    %c7_i32_30 = arith.constant 7 : i32
    %c0_i32_31 = arith.constant 0 : i32
    %54 = tpu.memref_slice %arg4[%c7_i32_30, %c0_i32_31] : memref<8x1024xf32, #tpu.memory_space<vmem>> -> memref<1x1024xf32, #tpu.memory_space<vmem>>
    %55 = tpu.memref_slice %arg5[%c7_i32_28] : memref<8x!tpu.dma_semaphore, #tpu.memory_space<semaphore_mem>> -> memref<1x!tpu.dma_semaphore, #tpu.memory_space<semaphore_mem>>
    %56 = tpu.memref_squeeze %55 : memref<1x!tpu.dma_semaphore, #tpu.memory_space<semaphore_mem>> -> memref<!tpu.dma_semaphore, #tpu.memory_space<semaphore_mem>>
    tpu.enqueue_dma source(%53 : memref<1x1024xf32, #tpu.memory_space<any>>) target(%54 : memref<1x1024xf32, #tpu.memory_space<vmem>>) target_semaphore(%56 : memref<!tpu.dma_semaphore, #tpu.memory_space<semaphore_mem>>)
    %c0_i32_32 = arith.constant 0 : i32
    %c0_i32_33 = arith.constant 0 : i32
    %c0_i32_34 = arith.constant 0 : i32
    %57 = tpu.memref_slice %arg2[%c0_i32_33, %c0_i32_34] : memref<4x1024xf32, #tpu.memory_space<any>> -> memref<1x1024xf32, #tpu.memory_space<any>>
    %c0_i32_35 = arith.constant 0 : i32
    %c0_i32_36 = arith.constant 0 : i32
    %58 = tpu.memref_slice %arg4[%c0_i32_35, %c0_i32_36] : memref<8x1024xf32, #tpu.memory_space<vmem>> -> memref<1x1024xf32, #tpu.memory_space<vmem>>
    %59 = tpu.memref_slice %arg5[%c0_i32_32] : memref<8x!tpu.dma_semaphore, #tpu.memory_space<semaphore_mem>> -> memref<1x!tpu.dma_semaphore, #tpu.memory_space<semaphore_mem>>
    %60 = tpu.memref_squeeze %59 : memref<1x!tpu.dma_semaphore, #tpu.memory_space<semaphore_mem>> -> memref<!tpu.dma_semaphore, #tpu.memory_space<semaphore_mem>>
    tpu.wait_dma2 semaphore(%60 : memref<!tpu.dma_semaphore, #tpu.memory_space<semaphore_mem>>) src(%57 : memref<1x1024xf32, #tpu.memory_space<any>>) dst(%58 : memref<1x1024xf32, #tpu.memory_space<vmem>>)
    %c1_i32_37 = arith.constant 1 : i32
    %c0_i32_38 = arith.constant 0 : i32
    %c0_i32_39 = arith.constant 0 : i32
    %61 = tpu.memref_slice %arg2[%c0_i32_38, %c0_i32_39] : memref<4x1024xf32, #tpu.memory_space<any>> -> memref<1x1024xf32, #tpu.memory_space<any>>
    %c1_i32_40 = arith.constant 1 : i32
    %c0_i32_41 = arith.constant 0 : i32
    %62 = tpu.memref_slice %arg4[%c1_i32_40, %c0_i32_41] : memref<8x1024xf32, #tpu.memory_space<vmem>> -> memref<1x1024xf32, #tpu.memory_space<vmem>>
    %63 = tpu.memref_slice %arg5[%c1_i32_37] : memref<8x!tpu.dma_semaphore, #tpu.memory_space<semaphore_mem>> -> memref<1x!tpu.dma_semaphore, #tpu.memory_space<semaphore_mem>>
    %64 = tpu.memref_squeeze %63 : memref<1x!tpu.dma_semaphore, #tpu.memory_space<semaphore_mem>> -> memref<!tpu.dma_semaphore, #tpu.memory_space<semaphore_mem>>
    tpu.wait_dma2 semaphore(%64 : memref<!tpu.dma_semaphore, #tpu.memory_space<semaphore_mem>>) src(%61 : memref<1x1024xf32, #tpu.memory_space<any>>) dst(%62 : memref<1x1024xf32, #tpu.memory_space<vmem>>)
    %c2_i32_42 = arith.constant 2 : i32
    %c0_i32_43 = arith.constant 0 : i32
    %c0_i32_44 = arith.constant 0 : i32
    %65 = tpu.memref_slice %arg2[%c0_i32_43, %c0_i32_44] : memref<4x1024xf32, #tpu.memory_space<any>> -> memref<1x1024xf32, #tpu.memory_space<any>>
    %c2_i32_45 = arith.constant 2 : i32
    %c0_i32_46 = arith.constant 0 : i32
    %66 = tpu.memref_slice %arg4[%c2_i32_45, %c0_i32_46] : memref<8x1024xf32, #tpu.memory_space<vmem>> -> memref<1x1024xf32, #tpu.memory_space<vmem>>
    %67 = tpu.memref_slice %arg5[%c2_i32_42] : memref<8x!tpu.dma_semaphore, #tpu.memory_space<semaphore_mem>> -> memref<1x!tpu.dma_semaphore, #tpu.memory_space<semaphore_mem>>
    %68 = tpu.memref_squeeze %67 : memref<1x!tpu.dma_semaphore, #tpu.memory_space<semaphore_mem>> -> memref<!tpu.dma_semaphore, #tpu.memory_space<semaphore_mem>>
    tpu.wait_dma2 semaphore(%68 : memref<!tpu.dma_semaphore, #tpu.memory_space<semaphore_mem>>) src(%65 : memref<1x1024xf32, #tpu.memory_space<any>>) dst(%66 : memref<1x1024xf32, #tpu.memory_space<vmem>>)
    %c3_i32_47 = arith.constant 3 : i32
    %c0_i32_48 = arith.constant 0 : i32
    %c0_i32_49 = arith.constant 0 : i32
    %69 = tpu.memref_slice %arg2[%c0_i32_48, %c0_i32_49] : memref<4x1024xf32, #tpu.memory_space<any>> -> memref<1x1024xf32, #tpu.memory_space<any>>
    %c3_i32_50 = arith.constant 3 : i32
    %c0_i32_51 = arith.constant 0 : i32
    %70 = tpu.memref_slice %arg4[%c3_i32_50, %c0_i32_51] : memref<8x1024xf32, #tpu.memory_space<vmem>> -> memref<1x1024xf32, #tpu.memory_space<vmem>>
    %71 = tpu.memref_slice %arg5[%c3_i32_47] : memref<8x!tpu.dma_semaphore, #tpu.memory_space<semaphore_mem>> -> memref<1x!tpu.dma_semaphore, #tpu.memory_space<semaphore_mem>>
    %72 = tpu.memref_squeeze %71 : memref<1x!tpu.dma_semaphore, #tpu.memory_space<semaphore_mem>> -> memref<!tpu.dma_semaphore, #tpu.memory_space<semaphore_mem>>
    tpu.wait_dma2 semaphore(%72 : memref<!tpu.dma_semaphore, #tpu.memory_space<semaphore_mem>>) src(%69 : memref<1x1024xf32, #tpu.memory_space<any>>) dst(%70 : memref<1x1024xf32, #tpu.memory_space<vmem>>)
    %c4_i32_52 = arith.constant 4 : i32
    %c0_i32_53 = arith.constant 0 : i32
    %c0_i32_54 = arith.constant 0 : i32
    %73 = tpu.memref_slice %arg2[%c0_i32_53, %c0_i32_54] : memref<4x1024xf32, #tpu.memory_space<any>> -> memref<1x1024xf32, #tpu.memory_space<any>>
    %c4_i32_55 = arith.constant 4 : i32
    %c0_i32_56 = arith.constant 0 : i32
    %74 = tpu.memref_slice %arg4[%c4_i32_55, %c0_i32_56] : memref<8x1024xf32, #tpu.memory_space<vmem>> -> memref<1x1024xf32, #tpu.memory_space<vmem>>
    %75 = tpu.memref_slice %arg5[%c4_i32_52] : memref<8x!tpu.dma_semaphore, #tpu.memory_space<semaphore_mem>> -> memref<1x!tpu.dma_semaphore, #tpu.memory_space<semaphore_mem>>
    %76 = tpu.memref_squeeze %75 : memref<1x!tpu.dma_semaphore, #tpu.memory_space<semaphore_mem>> -> memref<!tpu.dma_semaphore, #tpu.memory_space<semaphore_mem>>
    tpu.wait_dma2 semaphore(%76 : memref<!tpu.dma_semaphore, #tpu.memory_space<semaphore_mem>>) src(%73 : memref<1x1024xf32, #tpu.memory_space<any>>) dst(%74 : memref<1x1024xf32, #tpu.memory_space<vmem>>)
    %c5_i32_57 = arith.constant 5 : i32
    %c0_i32_58 = arith.constant 0 : i32
    %c0_i32_59 = arith.constant 0 : i32
    %77 = tpu.memref_slice %arg2[%c0_i32_58, %c0_i32_59] : memref<4x1024xf32, #tpu.memory_space<any>> -> memref<1x1024xf32, #tpu.memory_space<any>>
    %c5_i32_60 = arith.constant 5 : i32
    %c0_i32_61 = arith.constant 0 : i32
    %78 = tpu.memref_slice %arg4[%c5_i32_60, %c0_i32_61] : memref<8x1024xf32, #tpu.memory_space<vmem>> -> memref<1x1024xf32, #tpu.memory_space<vmem>>
    %79 = tpu.memref_slice %arg5[%c5_i32_57] : memref<8x!tpu.dma_semaphore, #tpu.memory_space<semaphore_mem>> -> memref<1x!tpu.dma_semaphore, #tpu.memory_space<semaphore_mem>>
    %80 = tpu.memref_squeeze %79 : memref<1x!tpu.dma_semaphore, #tpu.memory_space<semaphore_mem>> -> memref<!tpu.dma_semaphore, #tpu.memory_space<semaphore_mem>>
    tpu.wait_dma2 semaphore(%80 : memref<!tpu.dma_semaphore, #tpu.memory_space<semaphore_mem>>) src(%77 : memref<1x1024xf32, #tpu.memory_space<any>>) dst(%78 : memref<1x1024xf32, #tpu.memory_space<vmem>>)
    %c6_i32_62 = arith.constant 6 : i32
    %c0_i32_63 = arith.constant 0 : i32
    %c0_i32_64 = arith.constant 0 : i32
    %81 = tpu.memref_slice %arg2[%c0_i32_63, %c0_i32_64] : memref<4x1024xf32, #tpu.memory_space<any>> -> memref<1x1024xf32, #tpu.memory_space<any>>
    %c6_i32_65 = arith.constant 6 : i32
    %c0_i32_66 = arith.constant 0 : i32
    %82 = tpu.memref_slice %arg4[%c6_i32_65, %c0_i32_66] : memref<8x1024xf32, #tpu.memory_space<vmem>> -> memref<1x1024xf32, #tpu.memory_space<vmem>>
    %83 = tpu.memref_slice %arg5[%c6_i32_62] : memref<8x!tpu.dma_semaphore, #tpu.memory_space<semaphore_mem>> -> memref<1x!tpu.dma_semaphore, #tpu.memory_space<semaphore_mem>>
    %84 = tpu.memref_squeeze %83 : memref<1x!tpu.dma_semaphore, #tpu.memory_space<semaphore_mem>> -> memref<!tpu.dma_semaphore, #tpu.memory_space<semaphore_mem>>
    tpu.wait_dma2 semaphore(%84 : memref<!tpu.dma_semaphore, #tpu.memory_space<semaphore_mem>>) src(%81 : memref<1x1024xf32, #tpu.memory_space<any>>) dst(%82 : memref<1x1024xf32, #tpu.memory_space<vmem>>)
    %c7_i32_67 = arith.constant 7 : i32
    %c0_i32_68 = arith.constant 0 : i32
    %c0_i32_69 = arith.constant 0 : i32
    %85 = tpu.memref_slice %arg2[%c0_i32_68, %c0_i32_69] : memref<4x1024xf32, #tpu.memory_space<any>> -> memref<1x1024xf32, #tpu.memory_space<any>>
    %c7_i32_70 = arith.constant 7 : i32
    %c0_i32_71 = arith.constant 0 : i32
    %86 = tpu.memref_slice %arg4[%c7_i32_70, %c0_i32_71] : memref<8x1024xf32, #tpu.memory_space<vmem>> -> memref<1x1024xf32, #tpu.memory_space<vmem>>
    %87 = tpu.memref_slice %arg5[%c7_i32_67] : memref<8x!tpu.dma_semaphore, #tpu.memory_space<semaphore_mem>> -> memref<1x!tpu.dma_semaphore, #tpu.memory_space<semaphore_mem>>
    %88 = tpu.memref_squeeze %87 : memref<1x!tpu.dma_semaphore, #tpu.memory_space<semaphore_mem>> -> memref<!tpu.dma_semaphore, #tpu.memory_space<semaphore_mem>>
    tpu.wait_dma2 semaphore(%88 : memref<!tpu.dma_semaphore, #tpu.memory_space<semaphore_mem>>) src(%85 : memref<1x1024xf32, #tpu.memory_space<any>>) dst(%86 : memref<1x1024xf32, #tpu.memory_space<vmem>>)
    %c0 = arith.constant 0 : index
    %c0_72 = arith.constant 0 : index
    %89 = vector.load %arg4[%c0, %c0_72] : memref<8x1024xf32, #tpu.memory_space<vmem>>, vector<8x1024xf32>
    %cst = arith.constant -5.000000e-01 : f32
    %cst_73 = arith.constant 5.000000e-01 : f32
    %90 = vector.broadcast %cst : f32 to vector<8x1024xf32>
    %91 = arith.maximumf %90, %89 : vector<8x1024xf32>
    %92 = vector.broadcast %cst_73 : f32 to vector<8x1024xf32>
    %93 = arith.minimumf %92, %91 : vector<8x1024xf32>
    %cst_74 = arith.constant 5.000000e-01 : f32
    %94 = vector.broadcast %cst_74 : f32 to vector<8x1024xf32>
    %95 = arith.addf %93, %94 : vector<8x1024xf32>
    %c0_75 = arith.constant 0 : index
    %c0_76 = arith.constant 0 : index
    %96 = vector.load %arg3[%c0_75, %c0_76] : memref<8x1024xf32, #tpu.memory_space<vmem>>, vector<8x1024xf32>
    tpu.vector_store %arg3[%c0_75, %c0_76], %95 {strides = array<i32>} : memref<8x1024xf32, #tpu.memory_space<vmem>>, vector<8x1024xf32>,
    return
  }
  func.func @transform_1(%arg0: i32, %arg1: memref<8xi32, #tpu.memory_space<smem>>) -> (i32, i32) {
    %c0_i32 = arith.constant 0 : i32
    %c0_i32_0 = arith.constant 0 : i32
    return %arg0, %c0_i32 : i32, i32
  }
}

</mosaic_0001>

<bundles_post_ra>
// kernel: tpu_custom_call.1
= control target key start
LH: loop header
LB: loop body
LE: loop exit
PB: predicated region body
PF: predicated region fallthrough
CT: control target
= control target key end

     0   :  { %s594_s12 = smov [#allocation5]   ;;  %s753_s0 = inlined_call_operand.hbm [shape: s32[8], index: 0, kind: input, shape index: {}]   ;;  %s754_s1 = inlined_call_operand.hbm [shape: f32[4,1024], index: 1, kind: input, shape index: {}]   ;;  %s755_s2 = inlined_call_operand.hbm [shape: f32[8,1024], index: 2, kind: output, shape index: {}]  }
   0x1   :  { %s8_s11 = sshll.u32 %s753_s0, 4  ;;  %s9_s11 = int_to_ptr.hbm [resolvable:$true] %s8_s11 }
   0x2   :  { %11 = dma.hbm_to_smem %s9_s11, 16, %s594_s12, [#allocation4] }
   0x3   :  { %574 = dma.done.wait [#allocation4], 16 }
   0x4   :  { %575 = vsyncadd [#allocation4], 4294967280 }
   0x5   :  { %14 = sfence }
   0x6   :  { %15 = vsyncpa [#allocation7], 0  ;;  %s17_s13 = sld [smem:[#allocation5]]  ;;  %s595_s14 = smov [#allocation2]  }
   0x7   :  { %s625_s15 = sshll.u32 %s595_s14, 4  ;;  %s628_s16 = sld [smem:[#allocation5 + $0x1]]  ;;  %s26_s15 = int_to_ptr.vmem [resolvable:$true] %s625_s15 }
   0x8   :  { %s630_s17 = sld [smem:[#allocation5 + $0x2]]  ;;  %s596_s0 = smov [#allocation2 + $0x1]  }
   0x9   :  { %s632_s18 = sshll.u32 %s596_s0, 4  ;;  %s597_s23 = smov [#allocation2 + $0x2]   ;;  %s43_s18 = int_to_ptr.vmem [resolvable:$true] %s632_s18 }
   0xa   :  { %s635_s24 = sshll.u32 %s597_s23, 4  ;;  %s645_s8 = scalar_lea.hbm %s754_s1, 32  ;;  %s60_s24 = int_to_ptr.vmem [resolvable:$true] %s635_s24 }
   0xc   :  { %s18_s19 = sshrl.u32 %s17_s13, 2  ;;  %s19_s20 = sand.u32 3, %s17_s13  }
   0xd   :  { %s302_s21 = sshll.u32 %s18_s19, 5  ;;  %s33_s28 = sshrl.u32 %s628_s16, 2 }
   0xe   :  { %s21_s22 = sadd.s32 %s302_s21, %s19_s20  ;;  %s34_s30 = sand.u32 3, %s628_s16  }
   0xf   :  { %s22_s27 = scalar_lea.hbm %s754_s1, %s21_s22  ;;  %s304_s3 = sshll.u32 %s33_s28, 5 }
  0x10   :  { %s23_s29 = sshll.u32 %s22_s27, 4  ;;  %s24_s29 = int_to_ptr.hbm [resolvable:$true] %s23_s29 }
  0x11   :  { %s358_s4 = sshra.s32 %s24_s29, 4  ;;  %s359_s4 = int_to_ptr.hbm [resolvable:$true] %s358_s4 }
  0x12   :  { %s360_s5 = scalar_lea.hbm %s359_s4, 8  ;;  %p363_p1 = scmp.lt.s32.totalorder %s359_s4, %s754_s1 }
  0x13   :  { %p361_p0 = scmp.ne.s32.totalorder %s359_s4, %s360_s5  ;;  %p364_p2 = scmp.lt.s32.totalorder %s645_s8, %s360_s5 }
  0x15   :  { %p365_p3 = por %p364_p2, %p363_p1 }
  0x17   :  { %p366_p4 = pnand %p365_p3, %p361_p0 }
  0x19   :  { %369 = shalt.err (!%p366_p4)  }
  0x1a   :  { %s598_s11 = smov 64   ;;  %s599_s12 = smov 128  }
  0x1b   :  { %s600_s13 = smov 1   ;;  %s36_s14 = sadd.s32 %s304_s3, %s34_s30 }
  0x1c   :  { %30 = dma.hbm_to_vmem [thread:$0]  %s24_s29, 128, %s26_s15, [#allocation3], %s598_s11, %s599_s12, %s600_s13 }
  0x1d   :  { %s50_s16 = sshrl.u32 %s630_s17, 2  ;;  %s37_s20 = scalar_lea.hbm %s754_s1, %s36_s14 }
  0x1e   :  { %s51_s21 = sand.u32 3, %s630_s17   ;;  %s40_s22 = sshll.u32 %s37_s20, 4  ;;  %s41_s22 = int_to_ptr.hbm [resolvable:$true] %s40_s22 }
  0x1f   :  { %s306_s23 = sshll.u32 %s50_s16, 5  ;;  %s382_s26 = sshra.s32 %s41_s22, 4  ;;  %s383_s26 = int_to_ptr.hbm [resolvable:$true] %s382_s26 }
  0x20   :  { %s53_s25 = sadd.s32 %s306_s23, %s51_s21  ;;  %s384_s27 = scalar_lea.hbm %s383_s26, 8 }
  0x21   :  { %p385_p5 = scmp.ne.s32.totalorder %s383_s26, %s384_s27  ;;  %p387_p6 = scmp.lt.s32.totalorder %s383_s26, %s754_s1 }
  0x22   :  { %p388_p7 = scmp.lt.s32.totalorder %s645_s8, %s384_s27 }
  0x24   :  { %p389_p8 = por %p388_p7, %p387_p6 }
  0x26   :  { %p390_p9 = pnand %p389_p8, %p385_p5 }
  0x28   :  { %393 = shalt.err (!%p390_p9)  }
  0x29   :  { %47 = dma.hbm_to_vmem [thread:$0]  %s41_s22, 128, %s43_s18, [#allocation3 + $0x1], %s598_s11, %s599_s12, %s600_s13 }
  0x2a   :  { %s54_s29 = scalar_lea.hbm %s754_s1, %s53_s25  ;;  %s307_s3 = sld [smem:[#allocation5 + $0x3]] }
  0x2b   :  { %s57_s30 = sshll.u32 %s54_s29, 4  ;;  %s58_s30 = int_to_ptr.hbm [resolvable:$true] %s57_s30 }
  0x2c   :  { %s406_s5 = sshra.s32 %s58_s30, 4  ;;  %s407_s5 = int_to_ptr.hbm [resolvable:$true] %s406_s5 }
  0x2d   :  { %s408_s6 = scalar_lea.hbm %s407_s5, 8  ;;  %p411_p11 = scmp.lt.s32.totalorder %s407_s5, %s754_s1 }
  0x2e   :  { %p409_p10 = scmp.ne.s32.totalorder %s407_s5, %s408_s6  ;;  %p412_p12 = scmp.lt.s32.totalorder %s645_s8, %s408_s6 }
  0x30   :  { %p413_p13 = por %p412_p12, %p411_p11 }
  0x32   :  { %p414_p0 = pnand %p413_p13, %p409_p10 }
  0x34   :  { %417 = shalt.err (!%p414_p0)  }
  0x35   :  { %64 = dma.hbm_to_vmem [thread:$0]  %s58_s30, 128, %s60_s24, [#allocation3 + $0x2], %s598_s11, %s599_s12, %s600_s13 }
  0x36   :  { %s601_s18 = smov [#allocation2 + $0x3]   ;;  %s683_s14 = sld [smem:[#allocation5 + $0x4]] }
  0x37   :  { %s681_s10 = sshll.u32 %s601_s18, 4  ;;  %s602_s16 = smov [#allocation2 + $0x4]   ;;  %s77_s10 = int_to_ptr.vmem [resolvable:$true] %s681_s10 }
  0x38   :  { %s686_s0 = sshll.u32 %s602_s16, 4  ;;  %s688_s19 = sld [smem:[#allocation5 + $0x5]]  ;;  %s94_s0 = int_to_ptr.vmem [resolvable:$true] %s686_s0 }
  0x39   :  { %s67_s20 = sshrl.u32 %s307_s3, 2  ;;  %s68_s21 = sand.u32 3, %s307_s3  }
  0x3a   :  { %s308_s22 = sshll.u32 %s67_s20, 5 }
  0x3b   :  { %s70_s24 = sadd.s32 %s308_s22, %s68_s21 }
  0x3c   :  { %s71_s26 = scalar_lea.hbm %s754_s1, %s70_s24  ;;  %s84_s27 = sshrl.u32 %s683_s14, 2 }
  0x3d   :  { %s74_s28 = sshll.u32 %s71_s26, 4  ;;  %s85_s4 = sand.u32 3, %s683_s14   ;;  %s75_s28 = int_to_ptr.hbm [resolvable:$true] %s74_s28 }
  0x3e   :  { %s310_s15 = sshll.u32 %s84_s27, 5  ;;  %s430_s17 = sshra.s32 %s75_s28, 4  ;;  %s431_s17 = int_to_ptr.hbm [resolvable:$true] %s430_s17 }
  0x3f   :  { %s432_s29 = scalar_lea.hbm %s431_s17, 8  ;;  %p435_p2 = scmp.lt.s32.totalorder %s431_s17, %s754_s1 }
  0x40   :  { %p433_p1 = scmp.ne.s32.totalorder %s431_s17, %s432_s29  ;;  %p436_p3 = scmp.lt.s32.totalorder %s645_s8, %s432_s29 }
  0x42   :  { %p437_p4 = por %p436_p3, %p435_p2 }
  0x44   :  { %p438_p5 = pnand %p437_p4, %p433_p1 }
  0x46   :  { %441 = shalt.err (!%p438_p5)  }
  0x47   :  { %81 = dma.hbm_to_vmem [thread:$0]  %s75_s28, 128, %s77_s10, [#allocation3 + $0x3], %s598_s11, %s599_s12, %s600_s13 }
  0x48   :  { %s87_s3 = sadd.s32 %s310_s15, %s85_s4  ;;  %s101_s6 = sshrl.u32 %s688_s19, 2 }
  0x49   :  { %s88_s18 = scalar_lea.hbm %s754_s1, %s87_s3  ;;  %s102_s14 = sand.u32 3, %s688_s19  }
  0x4a   :  { %s91_s16 = sshll.u32 %s88_s18, 4  ;;  %s312_s20 = sshll.u32 %s101_s6, 5  ;;  %s92_s16 = int_to_ptr.hbm [resolvable:$true] %s91_s16 }
  0x4b   :  { %s104_s21 = sadd.s32 %s312_s20, %s102_s14  ;;  %s454_s22 = sshra.s32 %s92_s16, 4  ;;  %s455_s22 = int_to_ptr.hbm [resolvable:$true] %s454_s22 }
  0x4c   :  { %s456_s24 = scalar_lea.hbm %s455_s22, 8  ;;  %p459_p7 = scmp.lt.s32.totalorder %s455_s22, %s754_s1 }
  0x4d   :  { %p457_p6 = scmp.ne.s32.totalorder %s455_s22, %s456_s24  ;;  %p460_p8 = scmp.lt.s32.totalorder %s645_s8, %s456_s24 }
  0x4f   :  { %p461_p9 = por %p460_p8, %p459_p7 }
  0x51   :  { %p462_p10 = pnand %p461_p9, %p457_p6 }
  0x53   :  { %465 = shalt.err (!%p462_p10)  }
  0x54   :  { %98 = dma.hbm_to_vmem [thread:$0]  %s92_s16, 128, %s94_s0, [#allocation3 + $0x4], %s598_s11, %s599_s12, %s600_s13 }
  0x55   :  { %s105_s26 = scalar_lea.hbm %s754_s1, %s104_s21  ;;  %s603_s27 = smov [#allocation2 + $0x5]  }
  0x56   :  { %s110_s28 = sshll.u32 %s603_s27, 4  ;;  %s108_s4 = sshll.u32 %s105_s26, 4  ;;  %s111_s28 = int_to_ptr.vmem [resolvable:$true] %s110_s28  ;;  %s109_s4 = int_to_ptr.hbm [resolvable:$true] %s108_s4 }
  0x57   :  { %s313_s15 = sld [smem:[#allocation5 + $0x6]]  ;;  %s478_s17 = sshra.s32 %s109_s4, 4  ;;  %s479_s17 = int_to_ptr.hbm [resolvable:$true] %s478_s17 }
  0x58   :  { %s480_s29 = scalar_lea.hbm %s479_s17, 8  ;;  %p483_p12 = scmp.lt.s32.totalorder %s479_s17, %s754_s1 }
  0x59   :  { %p481_p11 = scmp.ne.s32.totalorder %s479_s17, %s480_s29  ;;  %p484_p13 = scmp.lt.s32.totalorder %s645_s8, %s480_s29 }
  0x5b   :  { %p485_p0 = por %p484_p13, %p483_p12 }
  0x5d   :  { %p486_p1 = pnand %p485_p0, %p481_p11 }
  0x5f   :  { %489 = shalt.err (!%p486_p1)  }
  0x60   :  { %115 = dma.hbm_to_vmem [thread:$0]  %s109_s4, 128, %s111_s28, [#allocation3 + $0x5], %s598_s11, %s599_s12, %s600_s13 }
  0x61   :  { %s315_s0 = sld [smem:[#allocation5 + $0x7]]  ;;  %s604_s3 = smov [#allocation2 + $0x6]  }
  0x62   :  { %s127_s6 = sshll.u32 %s604_s3, 4  ;;  %s118_s7 = sshrl.u32 %s313_s15, 2  ;;  %s128_s6 = int_to_ptr.vmem [resolvable:$true] %s127_s6 }
  0x63   :  { %s119_s9 = sand.u32 3, %s313_s15   ;;  %s314_s18 = sshll.u32 %s118_s7, 5 }
  0x64   :  { %s605_s14 = smov [#allocation2 + $0x7]   ;;  %s121_s20 = sadd.s32 %s314_s18, %s119_s9 }
  0x65   :  { %s727_s16 = sshll.u32 %s605_s14, 4  ;;  %s122_s23 = scalar_lea.hbm %s754_s1, %s121_s20  ;;  %s145_s16 = int_to_ptr.vmem [resolvable:$true] %s727_s16 }
  0x66   :  { %s125_s10 = sshll.u32 %s122_s23, 4  ;;  %s126_s10 = int_to_ptr.hbm [resolvable:$true] %s125_s10 }
  0x67   :  { %s135_s21 = sshrl.u32 %s315_s0, 2  ;;  %s136_s25 = sand.u32 3, %s315_s0  }
  0x68   :  { %s316_s19 = sshll.u32 %s135_s21, 5  ;;  %s502_s27 = sshra.s32 %s126_s10, 4  ;;  %s503_s27 = int_to_ptr.hbm [resolvable:$true] %s502_s27 }
  0x69   :  { %s138_s26 = sadd.s32 %s316_s19, %s136_s25  ;;  %s504_s28 = scalar_lea.hbm %s503_s27, 8 }
  0x6a   :  { %p505_p2 = scmp.ne.s32.totalorder %s503_s27, %s504_s28  ;;  %p507_p3 = scmp.lt.s32.totalorder %s503_s27, %s754_s1 }
  0x6b   :  { %p508_p4 = scmp.lt.s32.totalorder %s645_s8, %s504_s28 }
  0x6d   :  { %p509_p5 = por %p508_p4, %p507_p3 }
  0x6f   :  { %p510_p6 = pnand %p509_p5, %p505_p2 }
  0x71   :  { %513 = shalt.err (!%p510_p6)  }
  0x72   :  { %132 = dma.hbm_to_vmem [thread:$0]  %s126_s10, 128, %s128_s6, [#allocation3 + $0x6], %s598_s11, %s599_s12, %s600_s13 }
  0x73   :  { %s139_s30 = scalar_lea.hbm %s754_s1, %s138_s26 }
  0x74   :  { %s142_s5 = sshll.u32 %s139_s30, 4  ;;  %s143_s5 = int_to_ptr.hbm [resolvable:$true] %s142_s5 }
  0x75   :  { %s526_s0 = sshra.s32 %s143_s5, 4  ;;  %s527_s0 = int_to_ptr.hbm [resolvable:$true] %s526_s0 }
  0x76   :  { %s528_s3 = scalar_lea.hbm %s527_s0, 8  ;;  %p531_p8 = scmp.lt.s32.totalorder %s527_s0, %s754_s1 }
  0x77   :  { %p529_p7 = scmp.ne.s32.totalorder %s527_s0, %s528_s3  ;;  %p532_p9 = scmp.lt.s32.totalorder %s645_s8, %s528_s3 }
  0x79   :  { %p533_p10 = por %p532_p9, %p531_p8 }
  0x7b   :  { %p534_p11 = pnand %p533_p10, %p529_p7 }
  0x7d   :  { %537 = shalt.err (!%p534_p11)  }
  0x7e   :  { %149 = dma.hbm_to_vmem [thread:$0]  %s143_s5, 128, %s145_s16, [#allocation3 + $0x7], %s598_s11, %s599_s12, %s600_s13 }
  0x7f   :  { %576 = dma.done.wait [#allocation3], 128 }
  0x80   :  { %577 = vsyncadd [#allocation3], 4294967168 }
  0x81   :  { %578 = dma.done.wait [#allocation3 + $0x1], 128 }
  0x82   :  { %579 = vsyncadd [#allocation3 + $0x1], 4294967168 }
  0x83   :  { %580 = dma.done.wait [#allocation3 + $0x2], 128 }
  0x84   :  { %581 = vsyncadd [#allocation3 + $0x2], 4294967168 }
  0x85   :  { %582 = dma.done.wait [#allocation3 + $0x3], 128 }
  0x86   :  { %583 = vsyncadd [#allocation3 + $0x3], 4294967168 }
  0x87   :  { %584 = dma.done.wait [#allocation3 + $0x4], 128 }
  0x88   :  { %585 = vsyncadd [#allocation3 + $0x4], 4294967168 }
  0x89   :  { %586 = dma.done.wait [#allocation3 + $0x5], 128 }
  0x8a   :  { %587 = vsyncadd [#allocation3 + $0x5], 4294967168 }
  0x8b   :  { %588 = dma.done.wait [#allocation3 + $0x6], 128 }
  0x8c   :  { %589 = vsyncadd [#allocation3 + $0x6], 4294967168 }
  0x8d   :  { %590 = dma.done.wait [#allocation3 + $0x7], 128 }
  0x8e   :  { %591 = vsyncadd [#allocation3 + $0x7], 4294967168  ;;  %v167_v0 = vld [vmem:[#allocation2] sm:$0xff]  ;;  %v168_v1 = vld [vmem:[#allocation2 + $0x8] sm:$0xff]  ;;  %s606_s1 = smov [#allocation6]   ;;  %s214_s13 = sshll.u32 %s755_s2, 4  ;;  %s215_s13 = int_to_ptr.hbm [resolvable:$true] %s214_s13 }
  0x8f   :  { %v169_v2 = vld [vmem:[#allocation2 + $0x10] sm:$0xff]  ;;  %v317_v3 = vclamps-f32 %v167_v0, 0.5  ;;  %v318_v4 = vclamps-f32 %v168_v1, 0.5  ;;  %v170_v6 = vld [vmem:[#allocation2 + $0x18] sm:$0xff]  ;;  %v171_v7 = vld [vmem:[#allocation2 + $0x20] sm:$0xff]  ;;  %s212_s8 = sshll.u32 %s606_s1, 4  ;;  %s213_s8 = int_to_ptr.vmem [resolvable:$true] %s212_s8 }
  0x90   :  { %v319_v5 = vclamps-f32 %v169_v2, 0.5  ;;  %v172_v8 = vld [vmem:[#allocation2 + $0x28] sm:$0xff]  ;;  %v320_v9 = vclamps-f32 %v170_v6, 0.5  ;;  %v321_v10 = vclamps-f32 %v171_v7, 0.5  ;;  %v173_v12 = vld [vmem:[#allocation2 + $0x30] sm:$0xff]  ;;  %v174_v13 = vld [vmem:[#allocation2 + $0x38] sm:$0xff] }
  0x91   :  { %v322_v11 = vclamps-f32 %v172_v8, 0.5  ;;  %v191_v14 = vadd.f32 0.5, %v317_v3  ;;  %v192_v15 = vadd.f32 0.5, %v318_v4  ;;  %v323_v17 = vclamps-f32 %v173_v12, 0.5 }
  0x92   :  { %v193_v16 = vadd.f32 0.5, %v319_v5  ;;  %v194_v18 = vadd.f32 0.5, %v320_v9  ;;  %v324_v19 = vclamps-f32 %v174_v13, 0.5  ;;  %v195_v20 = vadd.f32 0.5, %v321_v10 }
  0x93   :  { %199 = vst [vmem:[#allocation6] sm:$0xff] %v191_v14  ;;  %v196_v21 = vadd.f32 0.5, %v322_v11  ;;  %v197_v22 = vadd.f32 0.5, %v323_v17 }
  0x94   :  { %200 = vst [vmem:[#allocation6 + $0x8] sm:$0xff] %v192_v15  ;;  %v198_v23 = vadd.f32 0.5, %v324_v19 }
  0x95   :  { %201 = vst [vmem:[#allocation6 + $0x10] sm:$0xff] %v193_v16 }
  0x96   :  { %202 = vst [vmem:[#allocation6 + $0x18] sm:$0xff] %v194_v18 }
  0x97   :  { %203 = vst [vmem:[#allocation6 + $0x20] sm:$0xff] %v195_v20 }
  0x98   :  { %204 = vst [vmem:[#allocation6 + $0x28] sm:$0xff] %v196_v21 }
  0x99   :  { %205 = vst [vmem:[#allocation6 + $0x30] sm:$0xff] %v197_v22 }
  0x9a   :  { %206 = vst [vmem:[#allocation6 + $0x38] sm:$0xff] %v198_v23 }
  0x9b   :  { %217 = dma.vmem_to_hbm [thread:$0]  %s213_s8, 1024, %s215_s13, [#allocation7]  }
  0x9c   :  { %592 = dma.done.wait [#allocation7], 1024  }
  0x9d   :  { %593 = vsyncadd [#allocation7], 4294966272 }
  0x9e   :  { %222 = vsyncpa [#allocation7], 1 }
  0x9f   :  { %223 = vsyncmov [#allocation3] }
  0xa2   :  { %s224_s6 = vpop.sfrf %223 }
  0xa3   :  { %p325_p12 = scmp.ne.s32.totalorder %s224_s6, 0 }
  0xa5   :  { %228 = shalt.err (%p325_p12)  }
  0xa6   :  { %230 = vsyncmov [#allocation3 + $0x1] }
  0xa9   :  { %s231_s18 = vpop.sfrf %230 }
  0xaa   :  { %p326_p13 = scmp.ne.s32.totalorder %s231_s18, 0 }
  0xac   :  { %235 = shalt.err (%p326_p13)  }
  0xad   :  { %237 = vsyncmov [#allocation3 + $0x2] }
  0xb0   :  { %s238_s2 = vpop.sfrf %237 }
  0xb1   :  { %p327_p0 = scmp.ne.s32.totalorder %s238_s2, 0 }
  0xb3   :  { %242 = shalt.err (%p327_p0)  }
  0xb4   :  { %244 = vsyncmov [#allocation3 + $0x3] }
  0xb7   :  { %s245_s14 = vpop.sfrf %244 }
  0xb8   :  { %p328_p1 = scmp.ne.s32.totalorder %s245_s14, 0 }
  0xba   :  { %249 = shalt.err (%p328_p1)  }
  0xbb   :  { %251 = vsyncmov [#allocation3 + $0x4] }
  0xbe   :  { %s252_s16 = vpop.sfrf %251 }
  0xbf   :  { %p329_p2 = scmp.ne.s32.totalorder %s252_s16, 0 }
  0xc1   :  { %256 = shalt.err (%p329_p2)  }
  0xc2   :  { %258 = vsyncmov [#allocation3 + $0x5] }
  0xc5   :  { %s259_s20 = vpop.sfrf %258 }
  0xc6   :  { %p330_p3 = scmp.ne.s32.totalorder %s259_s20, 0 }
  0xc8   :  { %263 = shalt.err (%p330_p3)  }
  0xc9   :  { %265 = vsyncmov [#allocation3 + $0x6] }
  0xcc   :  { %s266_s21 = vpop.sfrf %265 }
  0xcd   :  { %p331_p4 = scmp.ne.s32.totalorder %s266_s21, 0 }
  0xcf   :  { %270 = shalt.err (%p331_p4)  }
  0xd0   :  { %272 = vsyncmov [#allocation3 + $0x7] }
  0xd3   :  { %s273_s22 = vpop.sfrf %272 }
  0xd4   :  { %p332_p5 = scmp.ne.s32.totalorder %s273_s22, 0 }
  0xd6   :  { %277 = shalt.err (%p332_p5)  }

</bundles_post_ra>
